<compile_context>
chip_gen: v6e
topology: v6e:2x2x1
jax: 0.10.0
libtpu: 0.0.40
codegen_flags: <defaults>
</compile_context>

<pallas_src>
import functools

import jax
import jax.numpy as jnp
from jax import lax
from jax.experimental import pallas as pl
from jax.experimental.pallas import tpu as pltpu


def _round_up(x, m):
    return (x + m - 1) // m * m


def _res2net_kernel(x_ref, w_ref, bss_ref, out_ref, wide_ref, st_ref, yprev_ref,
                    *, scale, cin, cout, kernel_size, dilation, t_valid, pad,
                    tw, bsub):
    """One batch-block: the full fused Res2Net scale chain.

    Each of the `bsub` batch elements owns a tw-lane segment of the W=bsub*tw
    lane axis, so one MXU matmul per branch covers the whole batch block.
    Reflect padding uses a circular layout per segment: the right halo sits at
    local lanes [T, T+pad) and the left halo at local lanes [tw-pad, tw) (read
    back through the wrapping tap rolls), so it is built purely with rolls and
    iota-mask selects - no unaligned / single-lane stores, no scratch zeroing.
    """
    T = t_valid
    W = bsub * tw
    nrows = kernel_size * cin            # contraction rows before the bias row

    # Ones row pairing with the bias column folded into the weights.
    st_ref[nrows:nrows + 1, :] = jnp.ones((1, W), st_ref.dtype)

    # Branch 0: identity pass-through of the first chunk.  Lanes >= T of these
    # rows are never written (stale VMEM) and are cropped by the wrapper.
    for j in range(bsub):
        out_ref[j, 0:cin, 0:T] = x_ref[j, 0:cin, :].astype(out_ref.dtype)

    # Halo lane masks (one per reflect column), hoisted out of the branch loop.
    # Built with an iota + per-segment equality ORs (no integer div/mod).
    lane = lax.broadcasted_iota(jnp.int32, (1, W), 1)

    def _seg_mask(local_lane):
        m = lane == local_lane
        for j in range(1, bsub):
            m = jnp.logical_or(m, lane == j * tw + local_lane)
        return m

    right_masks = [_seg_mask(T + m) for m in range(pad)]
    left_masks = [_seg_mask(tw - pad + m) for m in range(pad)]

    for i in range(1, scale):            # static loop: scale is tiny (4 or 8)
        c0 = i * cin
        # Widen the chunk: each batch element into its own tw-lane segment
        # (offset-0 aligned store; only the trailing vreg column is masked).
        for j in range(bsub):
            wide_ref[:, j * tw:j * tw + T] = (
                x_ref[j, c0:c0 + cin, :].astype(jnp.float32))
        z = wide_ref[...]
        if i > 1:
            z = z + yprev_ref[...]       # residual add in f32

        # Reflect 'same' padding (circular per-segment layout):
        #   zp[local T + m]        = z[local T - 2 - m]        (right halo)
        #   zp[local tw - pad + m] = z[next segment's pad - m] (left halo,
        #                            read via the wrapping tap rolls)
        zp = z
        for m in range(pad):
            zp = jnp.where(right_masks[m],
                           pltpu.roll(z, shift=2 + 2 * m, axis=1), zp)
            zp = jnp.where(left_masks[m],
                           pltpu.roll(z, shift=(W - 2 * (pad - m)) % W, axis=1),
                           zp)

        zpc = zp.astype(st_ref.dtype)    # single late cast (bf16 path)

        # Stack the K dilated taps at row offsets k*cin of the matmul operand:
        #   stacked[k*cin + c, t] = zp[c, (t + k*dilation - pad) mod W]
        for k in range(kernel_size):
            off = k * dilation - pad
            tap = zpc if off == 0 else pltpu.roll(zpc, shift=(-off) % W, axis=1)
            st_ref[k * cin:(k + 1) * cin, :] = tap

        # One MXU matmul per branch; conv bias rides in the last weight column.
        acc = jnp.dot(w_ref[i - 1], st_ref[...],
                      preferred_element_type=jnp.float32)      # (cout, W) f32

        bn_scale = bss_ref[2 * (i - 1)]                        # (cout, 1)
        bn_shift = bss_ref[2 * (i - 1) + 1]
        y = jnp.maximum(acc, 0.0) * bn_scale + bn_shift

        if i + 1 < scale:                # residual for the next branch;
            yprev_ref[...] = y           # scratch bounds the live range

        ch0 = cin + (i - 1) * cout
        for j in range(bsub):            # lane-dense (128-aligned) out stores
            out_ref[j, ch0:ch0 + cout, :] = (
                y[:, j * tw:(j + 1) * tw].astype(out_ref.dtype))


def _vmem_limit_bytes():
    try:
        kind = jax.devices()[0].device_kind.lower()
    except Exception:
        kind = ""
    if ("v4" in kind) or ("v5" in kind) or ("v6" in kind):
        return 100 * 1024 * 1024         # 128 MiB parts: keep big full-T blocks
    return 48 * 1024 * 1024              # v7x (64 MiB VMEM) / unknown: headroom


def _pick_batch_block(B, C, c_total, T, tw, itemsize, budget_bytes):
    """Largest divisor of B whose double-buffered blocks fit the budget."""
    per_b = 2 * C * T * itemsize + 2 * c_total * tw * itemsize
    cap = max(1, min(8, budget_bytes // max(per_b, 1)))
    for d in range(min(B, cap), 0, -1):
        if B % d == 0:
            return d
    return 1


def res2net_block(x, params, *, scale, kernel_size, dilation, eps=1e-5,
                  matmul_dtype=jnp.float32, batch_block=None):
    """Res2NetBlock forward. x: (B, C, T) channels-first. Returns (B, C', T)."""
    B, C, T = x.shape
    assert C % scale == 0
    cin = C // scale
    nb = scale - 1
    assert nb >= 1
    cout = params[0]["w"].shape[0]
    if scale > 2:
        assert cin == cout, "residual add requires matching chunk widths"
    assert (dilation * (kernel_size - 1)) % 2 == 0, \
        "only odd kernel_size (symmetric 'same' padding) is implemented"
    pad = dilation * (kernel_size - 1) // 2
    assert 0 <= pad < T, "reflect padding requires pad < T"

    # Lane-dense working segment width; must hold data + both reflect halos so
    # the circular tap rolls can never wrap into valid output columns.
    tw = _round_up(T + 2 * pad, 128)
    assert tw >= T + 2 * pad

    c_total = cin + nb * cout
    vmem_limit = _vmem_limit_bytes()
    if batch_block is None:
        batch_block = _pick_batch_block(B, C, c_total, T, tw,
                                        x.dtype.itemsize, vmem_limit // 4)
    assert B % batch_block == 0, "batch_block must divide the batch size"
    bsub = batch_block
    W = bsub * tw

    # Conv weights: torch layout (Cout, Cin, K) -> (Cout, K*Cin) tap-major,
    # with the conv bias folded in as an extra trailing column (it pairs with
    # the ones row of the stacked matmul operand).
    wrows = []
    for p in params:
        wflat = jnp.transpose(p["w"], (0, 2, 1)).reshape(cout, kernel_size * cin)
        wrows.append(jnp.concatenate([wflat, p["b"].reshape(cout, 1)], axis=1))
    w_all = jnp.stack(wrows).astype(matmul_dtype)       # (nb, cout, K*cin+1)

    # Folded BatchNorm (inference): y = relu(conv + b) * bn_scale + bn_shift.
    rows = []
    for p in params:
        s = p["gamma"] * lax.rsqrt(p["var"] + eps)
        rows += [s, p["beta"] - p["mean"] * s]
    bss = jnp.stack([r.reshape(cout, 1) for r in rows]).astype(jnp.float32)

    kern = functools.partial(
        _res2net_kernel, scale=scale, cin=cin, cout=cout,
        kernel_size=kernel_size, dilation=dilation, t_valid=T, pad=pad,
        tw=tw, bsub=bsub)

    out = pl.pallas_call(
        kern,
        out_shape=jax.ShapeDtypeStruct((B, c_total, tw), x.dtype),
        grid_spec=pltpu.PrefetchScalarGridSpec(
            num_scalar_prefetch=0,
            grid=(B // bsub,),
            in_specs=[
                # x is passed unpadded: full-dim (C, T) blocks are exempt from
                # the (8,128) rule, so no wrapper-side jnp.pad HBM copy.
                pl.BlockSpec((bsub, C, T), lambda g: (g, 0, 0)),
                pl.BlockSpec((nb, cout, kernel_size * cin + 1),
                             lambda g: (0, 0, 0)),
                pl.BlockSpec((2 * nb, cout, 1), lambda g: (0, 0, 0)),
            ],
            out_specs=pl.BlockSpec((bsub, c_total, tw), lambda g: (g, 0, 0)),
            scratch_shapes=[
                pltpu.VMEM((cin, W), jnp.float32),                     # wide z
                pltpu.VMEM((kernel_size * cin + 1, W), matmul_dtype),  # stacked
                pltpu.VMEM((cout, W), jnp.float32),                    # y_prev
            ],
        ),
        compiler_params=pltpu.CompilerParams(
            dimension_semantics=("parallel",),
            vmem_limit_bytes=vmem_limit),
    )(x, w_all, bss)
    # TODO(synk): consumers that accept a time-padded layout could take `out`
    # directly and skip this crop (saves one HBM read+write of the output).
    return out[:, :, :T]


def _reference_res2net(x, params, *, scale, kernel_size, dilation, eps=1e-5,
                       matmul_dtype=jnp.float32):
    """Pure-JAX reference (lax.conv) for correctness checking."""
    pad = dilation * (kernel_size - 1) // 2
    chunks = jnp.split(x, scale, axis=1)
    ys = [chunks[0]]
    y_prev = None
    for i in range(1, scale):
        z = chunks[i] if i == 1 else chunks[i] + y_prev
        z_pad = jnp.pad(z, ((0, 0), (0, 0), (pad, pad)), mode="reflect")
        p = params[i - 1]
        conv = lax.conv_general_dilated(
            z_pad.astype(matmul_dtype), p["w"].astype(matmul_dtype),
            window_strides=(1,), padding="VALID", rhs_dilation=(dilation,),
            dimension_numbers=("NCH", "OIH", "NCH"),
            preferred_element_type=jnp.float32)
        bias = p["b"].astype(matmul_dtype).astype(jnp.float32)
        act = jnp.maximum(conv + bias[None, :, None], 0.0)
        inv = lax.rsqrt(p["var"] + eps)
        y_prev = ((act - p["mean"][None, :, None]) * inv[None, :, None]
                  * p["gamma"][None, :, None] + p["beta"][None, :, None])
        ys.append(y_prev)
    return jnp.concatenate(ys, axis=1)


def make_params(key, scale, in_channels, out_channels, kernel_size):
    cin = in_channels // scale
    cout = out_channels // scale
    params = []
    for _ in range(scale - 1):
        key, k1, k2, k3, k4, k5, k6 = jax.random.split(key, 7)
        params.append(dict(
            w=0.1 * jax.random.normal(k1, (cout, cin, kernel_size), jnp.float32),
            b=0.1 * jax.random.normal(k2, (cout,), jnp.float32),
            gamma=1.0 + 0.1 * jax.random.normal(k3, (cout,), jnp.float32),
            beta=0.05 * jax.random.normal(k4, (cout,), jnp.float32),
            mean=0.1 * jax.random.normal(k5, (cout,), jnp.float32),
            var=0.5 + 0.5 * jnp.abs(jax.random.normal(k6, (cout,), jnp.float32)),
        ))
    return params


if __name__ == "__main__":
    B, C, T = 2, 32, 64
    scale, kernel_size, dilation = 4, 3, 3

    key = jax.random.PRNGKey(0)
    kx, kp = jax.random.split(key)
    x = jax.random.normal(kx, (B, C, T), jnp.float32)   # (batch, channels, time)
    params = make_params(kp, scale, C, C, kernel_size)

    ref = _reference_res2net(x, params, scale=scale, kernel_size=kernel_size,
                             dilation=dilation, matmul_dtype=jnp.float32)

    # Exact PyTorch numerics path (f32 matmul), batched grid step (bsub=2).
    out = jax.block_until_ready(res2net_block(
        x, params, scale=scale, kernel_size=kernel_size, dilation=dilation,
        matmul_dtype=jnp.float32))
    assert out.shape == (B, C, T), out.shape
    err = float(jnp.max(jnp.abs(out - ref)))
    if err > 2e-3:
        raise AssertionError(f"f32 mismatch vs reference: max abs err {err}")

    # Same path with one batch element per grid step (exercise bsub=1 codegen).
    out1 = jax.block_until_ready(res2net_block(
        x, params, scale=scale, kernel_size=kernel_size, dilation=dilation,
        matmul_dtype=jnp.float32, batch_block=1))
    err1 = float(jnp.max(jnp.abs(out1 - ref)))
    if err1 > 2e-3:
        raise AssertionError(f"f32/bsub=1 mismatch vs reference: max err {err1}")

    # bf16-matmul path (recommended on v5e/v6e/v7x MXU) vs a bf16-matched ref.
    out_bf16 = jax.block_until_ready(res2net_block(
        x, params, scale=scale, kernel_size=kernel_size, dilation=dilation,
        matmul_dtype=jnp.bfloat16))
    ref_bf16 = _reference_res2net(x, params, scale=scale,
                                  kernel_size=kernel_size, dilation=dilation,
                                  matmul_dtype=jnp.bfloat16)
    err_bf16 = float(jnp.max(jnp.abs(out_bf16 - ref_bf16)))
    if err_bf16 > 1e-2:
        raise AssertionError(f"bf16 mismatch vs reference: max abs err {err_bf16}")

    print("KERNEL_OK")
</pallas_src>

<mosaic_0001>
module attributes {stable_mosaic.version = 11 : i64} {
  func.func @_res2net_kernel(%arg0: i32, %arg1: memref<2x32x64xf32, #tpu.memory_space<vmem>>, %arg2: memref<3x8x25xf32, #tpu.memory_space<vmem>>, %arg3: memref<6x8x1xf32, #tpu.memory_space<vmem>>, %arg4: memref<2x32x128xf32, #tpu.memory_space<vmem>>, %arg5: memref<8x256xf32, #tpu.memory_space<vmem>>, %arg6: memref<25x256xf32, #tpu.memory_space<vmem>>, %arg7: memref<8x256xf32, #tpu.memory_space<vmem>>) attributes {dimension_semantics = [#tpu.dimension_semantics<parallel>], iteration_bounds = array<i64: 1>, scalar_prefetch = 0 : i64, scratch_operands = 3 : i64, tpu.core_type = #tpu.core_type<tc>, window_params = [{transform_indices = @transform_0, window_bounds = array<i64: 2, 32, 64>}, {pipeline_mode = #tpu.pipeline_mode<synchronous>, transform_indices = @transform_1, window_bounds = array<i64: 3, 8, 25>}, {pipeline_mode = #tpu.pipeline_mode<synchronous>, transform_indices = @transform_2, window_bounds = array<i64: 6, 8, 1>}, {transform_indices = @transform_3, window_bounds = array<i64: 2, 32, 128>}]} {
    %cst = arith.constant 1.000000e+00 : f32
    %0 = vector.broadcast %cst : f32 to vector<1x256xf32>
    %c24 = arith.constant 24 : index
    %c0 = arith.constant 0 : index
    %1 = vector.load %arg6[%c24, %c0] : memref<25x256xf32, #tpu.memory_space<vmem>>, vector<1x256xf32>
    tpu.vector_store %arg6[%c24, %c0], %0 {strides = array<i32>} : memref<25x256xf32, #tpu.memory_space<vmem>>, vector<1x256xf32>,
    %c0_0 = arith.constant 0 : index
    %c0_1 = arith.constant 0 : index
    %c0_2 = arith.constant 0 : index
    %2 = vector.load %arg1[%c0_0, %c0_1, %c0_2] : memref<2x32x64xf32, #tpu.memory_space<vmem>>, vector<1x8x64xf32>
    %3 = vector.shape_cast %2 : vector<1x8x64xf32> to vector<8x64xf32>
    %c0_3 = arith.constant 0 : index
    %c0_4 = arith.constant 0 : index
    %c0_5 = arith.constant 0 : index
    %4 = vector.load %arg4[%c0_3, %c0_4, %c0_5] : memref<2x32x128xf32, #tpu.memory_space<vmem>>, vector<1x8x64xf32>
    %5 = vector.shape_cast %4 : vector<1x8x64xf32> to vector<8x64xf32>
    %6 = vector.shape_cast %3 : vector<8x64xf32> to vector<1x8x64xf32>
    tpu.vector_store %arg4[%c0_3, %c0_4, %c0_5], %6 {strides = array<i32>} : memref<2x32x128xf32, #tpu.memory_space<vmem>>, vector<1x8x64xf32>,
    %c1 = arith.constant 1 : index
    %c0_6 = arith.constant 0 : index
    %c0_7 = arith.constant 0 : index
    %7 = vector.load %arg1[%c1, %c0_6, %c0_7] : memref<2x32x64xf32, #tpu.memory_space<vmem>>, vector<1x8x64xf32>
    %8 = vector.shape_cast %7 : vector<1x8x64xf32> to vector<8x64xf32>
    %c1_8 = arith.constant 1 : index
    %c0_9 = arith.constant 0 : index
    %c0_10 = arith.constant 0 : index
    %9 = vector.load %arg4[%c1_8, %c0_9, %c0_10] : memref<2x32x128xf32, #tpu.memory_space<vmem>>, vector<1x8x64xf32>
    %10 = vector.shape_cast %9 : vector<1x8x64xf32> to vector<8x64xf32>
    %11 = vector.shape_cast %8 : vector<8x64xf32> to vector<1x8x64xf32>
    tpu.vector_store %arg4[%c1_8, %c0_9, %c0_10], %11 {strides = array<i32>} : memref<2x32x128xf32, #tpu.memory_space<vmem>>, vector<1x8x64xf32>,
    %12 = tpu.iota {dimensions = array<i32: 1>} : vector<1x256xi32>
    %c64_i32 = arith.constant 64 : i32
    %13 = vector.broadcast %c64_i32 : i32 to vector<1x256xi32>
    %14 = arith.cmpi eq, %12, %13 : vector<1x256xi32>
    %c192_i32 = arith.constant 192 : i32
    %15 = vector.broadcast %c192_i32 : i32 to vector<1x256xi32>
    %16 = arith.cmpi eq, %12, %15 : vector<1x256xi32>
    %17 = arith.ori %14, %16 : vector<1x256xi1>
    %c65_i32 = arith.constant 65 : i32
    %18 = vector.broadcast %c65_i32 : i32 to vector<1x256xi32>
    %19 = arith.cmpi eq, %12, %18 : vector<1x256xi32>
    %c193_i32 = arith.constant 193 : i32
    %20 = vector.broadcast %c193_i32 : i32 to vector<1x256xi32>
    %21 = arith.cmpi eq, %12, %20 : vector<1x256xi32>
    %22 = arith.ori %19, %21 : vector<1x256xi1>
    %c66_i32 = arith.constant 66 : i32
    %23 = vector.broadcast %c66_i32 : i32 to vector<1x256xi32>
    %24 = arith.cmpi eq, %12, %23 : vector<1x256xi32>
    %c194_i32 = arith.constant 194 : i32
    %25 = vector.broadcast %c194_i32 : i32 to vector<1x256xi32>
    %26 = arith.cmpi eq, %12, %25 : vector<1x256xi32>
    %27 = arith.ori %24, %26 : vector<1x256xi1>
    %c125_i32 = arith.constant 125 : i32
    %28 = vector.broadcast %c125_i32 : i32 to vector<1x256xi32>
    %29 = arith.cmpi eq, %12, %28 : vector<1x256xi32>
    %c253_i32 = arith.constant 253 : i32
    %30 = vector.broadcast %c253_i32 : i32 to vector<1x256xi32>
    %31 = arith.cmpi eq, %12, %30 : vector<1x256xi32>
    %32 = arith.ori %29, %31 : vector<1x256xi1>
    %c126_i32 = arith.constant 126 : i32
    %33 = vector.broadcast %c126_i32 : i32 to vector<1x256xi32>
    %34 = arith.cmpi eq, %12, %33 : vector<1x256xi32>
    %c254_i32 = arith.constant 254 : i32
    %35 = vector.broadcast %c254_i32 : i32 to vector<1x256xi32>
    %36 = arith.cmpi eq, %12, %35 : vector<1x256xi32>
    %37 = arith.ori %34, %36 : vector<1x256xi1>
    %c127_i32 = arith.constant 127 : i32
    %38 = vector.broadcast %c127_i32 : i32 to vector<1x256xi32>
    %39 = arith.cmpi eq, %12, %38 : vector<1x256xi32>
    %c255_i32 = arith.constant 255 : i32
    %40 = vector.broadcast %c255_i32 : i32 to vector<1x256xi32>
    %41 = arith.cmpi eq, %12, %40 : vector<1x256xi32>
    %42 = arith.ori %39, %41 : vector<1x256xi1>
    %c0_11 = arith.constant 0 : index
    %c8 = arith.constant 8 : index
    %c0_12 = arith.constant 0 : index
    %43 = vector.load %arg1[%c0_11, %c8, %c0_12] : memref<2x32x64xf32, #tpu.memory_space<vmem>>, vector<1x8x64xf32>
    %44 = vector.shape_cast %43 : vector<1x8x64xf32> to vector<8x64xf32>
    %c0_13 = arith.constant 0 : index
    %c0_14 = arith.constant 0 : index
    %45 = vector.load %arg5[%c0_13, %c0_14] : memref<8x256xf32, #tpu.memory_space<vmem>>, vector<8x64xf32>
    tpu.vector_store %arg5[%c0_13, %c0_14], %44 {strides = array<i32>} : memref<8x256xf32, #tpu.memory_space<vmem>>, vector<8x64xf32>,
    %c1_15 = arith.constant 1 : index
    %c8_16 = arith.constant 8 : index
    %c0_17 = arith.constant 0 : index
    %46 = vector.load %arg1[%c1_15, %c8_16, %c0_17] : memref<2x32x64xf32, #tpu.memory_space<vmem>>, vector<1x8x64xf32>
    %47 = vector.shape_cast %46 : vector<1x8x64xf32> to vector<8x64xf32>
    %c0_18 = arith.constant 0 : index
    %c128 = arith.constant 128 : index
    %48 = vector.load %arg5[%c0_18, %c128] : memref<8x256xf32, #tpu.memory_space<vmem>>, vector<8x64xf32>
    tpu.vector_store %arg5[%c0_18, %c128], %47 {strides = array<i32>} : memref<8x256xf32, #tpu.memory_space<vmem>>, vector<8x64xf32>,
    %c0_19 = arith.constant 0 : index
    %c0_20 = arith.constant 0 : index
    %49 = vector.load %arg5[%c0_19, %c0_20] : memref<8x256xf32, #tpu.memory_space<vmem>>, vector<8x256xf32>
    %c2_i32 = arith.constant 2 : i32
    %50 = tpu.dynamic_rotate %49 by %c2_i32 dim 1 : vector<8x256xf32>, i32 -> vector<8x256xf32>
    %51 = vector.shape_cast %17 : vector<1x256xi1> to vector<1x256xi1>
    %52 = vector.broadcast %51 : vector<1x256xi1> to vector<8x256xi1>
    %53 = arith.select %52, %50, %49 : vector<8x256xi1>, vector<8x256xf32>
    %c250_i32 = arith.constant 250 : i32
    %54 = tpu.dynamic_rotate %49 by %c250_i32 dim 1 : vector<8x256xf32>, i32 -> vector<8x256xf32>
    %55 = vector.shape_cast %32 : vector<1x256xi1> to vector<1x256xi1>
    %56 = vector.broadcast %55 : vector<1x256xi1> to vector<8x256xi1>
    %57 = arith.select %56, %54, %53 : vector<8x256xi1>, vector<8x256xf32>
    %c4_i32 = arith.constant 4 : i32
    %58 = tpu.dynamic_rotate %49 by %c4_i32 dim 1 : vector<8x256xf32>, i32 -> vector<8x256xf32>
    %59 = vector.shape_cast %22 : vector<1x256xi1> to vector<1x256xi1>
    %60 = vector.broadcast %59 : vector<1x256xi1> to vector<8x256xi1>
    %61 = arith.select %60, %58, %57 : vector<8x256xi1>, vector<8x256xf32>
    %c252_i32 = arith.constant 252 : i32
    %62 = tpu.dynamic_rotate %49 by %c252_i32 dim 1 : vector<8x256xf32>, i32 -> vector<8x256xf32>
    %63 = vector.shape_cast %37 : vector<1x256xi1> to vector<1x256xi1>
    %64 = vector.broadcast %63 : vector<1x256xi1> to vector<8x256xi1>
    %65 = arith.select %64, %62, %61 : vector<8x256xi1>, vector<8x256xf32>
    %c6_i32 = arith.constant 6 : i32
    %66 = tpu.dynamic_rotate %49 by %c6_i32 dim 1 : vector<8x256xf32>, i32 -> vector<8x256xf32>
    %67 = vector.shape_cast %27 : vector<1x256xi1> to vector<1x256xi1>
    %68 = vector.broadcast %67 : vector<1x256xi1> to vector<8x256xi1>
    %69 = arith.select %68, %66, %65 : vector<8x256xi1>, vector<8x256xf32>
    %c254_i32_21 = arith.constant 254 : i32
    %70 = tpu.dynamic_rotate %49 by %c254_i32_21 dim 1 : vector<8x256xf32>, i32 -> vector<8x256xf32>
    %71 = vector.shape_cast %42 : vector<1x256xi1> to vector<1x256xi1>
    %72 = vector.broadcast %71 : vector<1x256xi1> to vector<8x256xi1>
    %73 = arith.select %72, %70, %69 : vector<8x256xi1>, vector<8x256xf32>
    %c3_i32 = arith.constant 3 : i32
    %74 = tpu.dynamic_rotate %73 by %c3_i32 dim 1 : vector<8x256xf32>, i32 -> vector<8x256xf32>
    %c0_22 = arith.constant 0 : index
    %c0_23 = arith.constant 0 : index
    %75 = vector.load %arg6[%c0_22, %c0_23] : memref<25x256xf32, #tpu.memory_space<vmem>>, vector<8x256xf32>
    tpu.vector_store %arg6[%c0_22, %c0_23], %74 {strides = array<i32>} : memref<25x256xf32, #tpu.memory_space<vmem>>, vector<8x256xf32>,
    %c8_24 = arith.constant 8 : index
    %c0_25 = arith.constant 0 : index
    %76 = vector.load %arg6[%c8_24, %c0_25] : memref<25x256xf32, #tpu.memory_space<vmem>>, vector<8x256xf32>
    tpu.vector_store %arg6[%c8_24, %c0_25], %73 {strides = array<i32>} : memref<25x256xf32, #tpu.memory_space<vmem>>, vector<8x256xf32>,
    %c253_i32_26 = arith.constant 253 : i32
    %77 = tpu.dynamic_rotate %73 by %c253_i32_26 dim 1 : vector<8x256xf32>, i32 -> vector<8x256xf32>
    %c16 = arith.constant 16 : index
    %c0_27 = arith.constant 0 : index
    %78 = vector.load %arg6[%c16, %c0_27] : memref<25x256xf32, #tpu.memory_space<vmem>>, vector<8x256xf32>
    tpu.vector_store %arg6[%c16, %c0_27], %77 {strides = array<i32>} : memref<25x256xf32, #tpu.memory_space<vmem>>, vector<8x256xf32>,
    %c0_28 = arith.constant 0 : index
    %c0_29 = arith.constant 0 : index
    %c0_30 = arith.constant 0 : index
    %79 = vector.load %arg2[%c0_28, %c0_29, %c0_30] : memref<3x8x25xf32, #tpu.memory_space<vmem>>, vector<1x8x25xf32>
    %80 = vector.shape_cast %79 : vector<1x8x25xf32> to vector<8x25xf32>
    %c0_31 = arith.constant 0 : index
    %c0_32 = arith.constant 0 : index
    %81 = vector.load %arg6[%c0_31, %c0_32] : memref<25x256xf32, #tpu.memory_space<vmem>>, vector<25x256xf32>
    %cst_33 = arith.constant dense<0.000000e+00> : vector<8x256xf32>
    %82 = tpu.matmul %80, %81, %cst_33 {dimension_numbers = #tpu.dot_dimension_numbers<[1], [0], [0], [1], [0, 0, 1, 1], [], []>} : vector<8x25xf32>, vector<25x256xf32>, vector<8x256xf32> -> vector<8x256xf32>
    %c0_34 = arith.constant 0 : index
    %c0_35 = arith.constant 0 : index
    %c0_36 = arith.constant 0 : index
    %83 = vector.load %arg3[%c0_34, %c0_35, %c0_36] : memref<6x8x1xf32, #tpu.memory_space<vmem>>, vector<1x8x1xf32>
    %84 = vector.shape_cast %83 : vector<1x8x1xf32> to vector<8x1xf32>
    %c1_37 = arith.constant 1 : index
    %c0_38 = arith.constant 0 : index
    %c0_39 = arith.constant 0 : index
    %85 = vector.load %arg3[%c1_37, %c0_38, %c0_39] : memref<6x8x1xf32, #tpu.memory_space<vmem>>, vector<1x8x1xf32>
    %86 = vector.shape_cast %85 : vector<1x8x1xf32> to vector<8x1xf32>
    %cst_40 = arith.constant 0.000000e+00 : f32
    %87 = vector.broadcast %cst_40 : f32 to vector<8x256xf32>
    %88 = arith.maximumf %82, %87 : vector<8x256xf32>
    %89 = vector.broadcast %84 : vector<8x1xf32> to vector<8x256xf32>
    %90 = arith.mulf %88, %89 : vector<8x256xf32>
    %91 = vector.broadcast %86 : vector<8x1xf32> to vector<8x256xf32>
    %92 = arith.addf %90, %91 : vector<8x256xf32>
    %c0_41 = arith.constant 0 : index
    %c0_42 = arith.constant 0 : index
    %93 = vector.load %arg7[%c0_41, %c0_42] : memref<8x256xf32, #tpu.memory_space<vmem>>, vector<8x256xf32>
    tpu.vector_store %arg7[%c0_41, %c0_42], %92 {strides = array<i32>} : memref<8x256xf32, #tpu.memory_space<vmem>>, vector<8x256xf32>,
    %94 = vector.extract_strided_slice %92 {offsets = [0, 0], sizes = [8, 128], strides = [1, 1]} : vector<8x256xf32> to vector<8x128xf32>
    %c0_43 = arith.constant 0 : index
    %c8_44 = arith.constant 8 : index
    %c0_45 = arith.constant 0 : index
    %95 = vector.load %arg4[%c0_43, %c8_44, %c0_45] : memref<2x32x128xf32, #tpu.memory_space<vmem>>, vector<1x8x128xf32>
    %96 = vector.shape_cast %95 : vector<1x8x128xf32> to vector<8x128xf32>
    %97 = vector.shape_cast %94 : vector<8x128xf32> to vector<1x8x128xf32>
    tpu.vector_store %arg4[%c0_43, %c8_44, %c0_45], %97 {strides = array<i32>} : memref<2x32x128xf32, #tpu.memory_space<vmem>>, vector<1x8x128xf32>,
    %98 = vector.extract_strided_slice %92 {offsets = [0, 128], sizes = [8, 128], strides = [1, 1]} : vector<8x256xf32> to vector<8x128xf32>
    %c1_46 = arith.constant 1 : index
    %c8_47 = arith.constant 8 : index
    %c0_48 = arith.constant 0 : index
    %99 = vector.load %arg4[%c1_46, %c8_47, %c0_48] : memref<2x32x128xf32, #tpu.memory_space<vmem>>, vector<1x8x128xf32>
    %100 = vector.shape_cast %99 : vector<1x8x128xf32> to vector<8x128xf32>
    %101 = vector.shape_cast %98 : vector<8x128xf32> to vector<1x8x128xf32>
    tpu.vector_store %arg4[%c1_46, %c8_47, %c0_48], %101 {strides = array<i32>} : memref<2x32x128xf32, #tpu.memory_space<vmem>>, vector<1x8x128xf32>,
    %c0_49 = arith.constant 0 : index
    %c16_50 = arith.constant 16 : index
    %c0_51 = arith.constant 0 : index
    %102 = vector.load %arg1[%c0_49, %c16_50, %c0_51] : memref<2x32x64xf32, #tpu.memory_space<vmem>>, vector<1x8x64xf32>
    %103 = vector.shape_cast %102 : vector<1x8x64xf32> to vector<8x64xf32>
    %c0_52 = arith.constant 0 : index
    %c0_53 = arith.constant 0 : index
    %104 = vector.load %arg5[%c0_52, %c0_53] : memref<8x256xf32, #tpu.memory_space<vmem>>, vector<8x64xf32>
    tpu.vector_store %arg5[%c0_52, %c0_53], %103 {strides = array<i32>} : memref<8x256xf32, #tpu.memory_space<vmem>>, vector<8x64xf32>,
    %c1_54 = arith.constant 1 : index
    %c16_55 = arith.constant 16 : index
    %c0_56 = arith.constant 0 : index
    %105 = vector.load %arg1[%c1_54, %c16_55, %c0_56] : memref<2x32x64xf32, #tpu.memory_space<vmem>>, vector<1x8x64xf32>
    %106 = vector.shape_cast %105 : vector<1x8x64xf32> to vector<8x64xf32>
    %c0_57 = arith.constant 0 : index
    %c128_58 = arith.constant 128 : index
    %107 = vector.load %arg5[%c0_57, %c128_58] : memref<8x256xf32, #tpu.memory_space<vmem>>, vector<8x64xf32>
    tpu.vector_store %arg5[%c0_57, %c128_58], %106 {strides = array<i32>} : memref<8x256xf32, #tpu.memory_space<vmem>>, vector<8x64xf32>,
    %c0_59 = arith.constant 0 : index
    %c0_60 = arith.constant 0 : index
    %108 = vector.load %arg5[%c0_59, %c0_60] : memref<8x256xf32, #tpu.memory_space<vmem>>, vector<8x256xf32>
    %c0_61 = arith.constant 0 : index
    %c0_62 = arith.constant 0 : index
    %109 = vector.load %arg7[%c0_61, %c0_62] : memref<8x256xf32, #tpu.memory_space<vmem>>, vector<8x256xf32>
    %110 = arith.addf %108, %109 : vector<8x256xf32>
    %c2_i32_63 = arith.constant 2 : i32
    %111 = tpu.dynamic_rotate %110 by %c2_i32_63 dim 1 : vector<8x256xf32>, i32 -> vector<8x256xf32>
    %112 = vector.shape_cast %17 : vector<1x256xi1> to vector<1x256xi1>
    %113 = vector.broadcast %112 : vector<1x256xi1> to vector<8x256xi1>
    %114 = arith.select %113, %111, %110 : vector<8x256xi1>, vector<8x256xf32>
    %c250_i32_64 = arith.constant 250 : i32
    %115 = tpu.dynamic_rotate %110 by %c250_i32_64 dim 1 : vector<8x256xf32>, i32 -> vector<8x256xf32>
    %116 = vector.shape_cast %32 : vector<1x256xi1> to vector<1x256xi1>
    %117 = vector.broadcast %116 : vector<1x256xi1> to vector<8x256xi1>
    %118 = arith.select %117, %115, %114 : vector<8x256xi1>, vector<8x256xf32>
    %c4_i32_65 = arith.constant 4 : i32
    %119 = tpu.dynamic_rotate %110 by %c4_i32_65 dim 1 : vector<8x256xf32>, i32 -> vector<8x256xf32>
    %120 = vector.shape_cast %22 : vector<1x256xi1> to vector<1x256xi1>
    %121 = vector.broadcast %120 : vector<1x256xi1> to vector<8x256xi1>
    %122 = arith.select %121, %119, %118 : vector<8x256xi1>, vector<8x256xf32>
    %c252_i32_66 = arith.constant 252 : i32
    %123 = tpu.dynamic_rotate %110 by %c252_i32_66 dim 1 : vector<8x256xf32>, i32 -> vector<8x256xf32>
    %124 = vector.shape_cast %37 : vector<1x256xi1> to vector<1x256xi1>
    %125 = vector.broadcast %124 : vector<1x256xi1> to vector<8x256xi1>
    %126 = arith.select %125, %123, %122 : vector<8x256xi1>, vector<8x256xf32>
    %c6_i32_67 = arith.constant 6 : i32
    %127 = tpu.dynamic_rotate %110 by %c6_i32_67 dim 1 : vector<8x256xf32>, i32 -> vector<8x256xf32>
    %128 = vector.shape_cast %27 : vector<1x256xi1> to vector<1x256xi1>
    %129 = vector.broadcast %128 : vector<1x256xi1> to vector<8x256xi1>
    %130 = arith.select %129, %127, %126 : vector<8x256xi1>, vector<8x256xf32>
    %c254_i32_68 = arith.constant 254 : i32
    %131 = tpu.dynamic_rotate %110 by %c254_i32_68 dim 1 : vector<8x256xf32>, i32 -> vector<8x256xf32>
    %132 = vector.shape_cast %42 : vector<1x256xi1> to vector<1x256xi1>
    %133 = vector.broadcast %132 : vector<1x256xi1> to vector<8x256xi1>
    %134 = arith.select %133, %131, %130 : vector<8x256xi1>, vector<8x256xf32>
    %c3_i32_69 = arith.constant 3 : i32
    %135 = tpu.dynamic_rotate %134 by %c3_i32_69 dim 1 : vector<8x256xf32>, i32 -> vector<8x256xf32>
    %c0_70 = arith.constant 0 : index
    %c0_71 = arith.constant 0 : index
    %136 = vector.load %arg6[%c0_70, %c0_71] : memref<25x256xf32, #tpu.memory_space<vmem>>, vector<8x256xf32>
    tpu.vector_store %arg6[%c0_70, %c0_71], %135 {strides = array<i32>} : memref<25x256xf32, #tpu.memory_space<vmem>>, vector<8x256xf32>,
    %c8_72 = arith.constant 8 : index
    %c0_73 = arith.constant 0 : index
    %137 = vector.load %arg6[%c8_72, %c0_73] : memref<25x256xf32, #tpu.memory_space<vmem>>, vector<8x256xf32>
    tpu.vector_store %arg6[%c8_72, %c0_73], %134 {strides = array<i32>} : memref<25x256xf32, #tpu.memory_space<vmem>>, vector<8x256xf32>,
    %c253_i32_74 = arith.constant 253 : i32
    %138 = tpu.dynamic_rotate %134 by %c253_i32_74 dim 1 : vector<8x256xf32>, i32 -> vector<8x256xf32>
    %c16_75 = arith.constant 16 : index
    %c0_76 = arith.constant 0 : index
    %139 = vector.load %arg6[%c16_75, %c0_76] : memref<25x256xf32, #tpu.memory_space<vmem>>, vector<8x256xf32>
    tpu.vector_store %arg6[%c16_75, %c0_76], %138 {strides = array<i32>} : memref<25x256xf32, #tpu.memory_space<vmem>>, vector<8x256xf32>,
    %c1_77 = arith.constant 1 : index
    %c0_78 = arith.constant 0 : index
    %c0_79 = arith.constant 0 : index
    %140 = vector.load %arg2[%c1_77, %c0_78, %c0_79] : memref<3x8x25xf32, #tpu.memory_space<vmem>>, vector<1x8x25xf32>
    %141 = vector.shape_cast %140 : vector<1x8x25xf32> to vector<8x25xf32>
    %c0_80 = arith.constant 0 : index
    %c0_81 = arith.constant 0 : index
    %142 = vector.load %arg6[%c0_80, %c0_81] : memref<25x256xf32, #tpu.memory_space<vmem>>, vector<25x256xf32>
    %cst_82 = arith.constant dense<0.000000e+00> : vector<8x256xf32>
    %143 = tpu.matmul %141, %142, %cst_82 {dimension_numbers = #tpu.dot_dimension_numbers<[1], [0], [0], [1], [0, 0, 1, 1], [], []>} : vector<8x25xf32>, vector<25x256xf32>, vector<8x256xf32> -> vector<8x256xf32>
    %c2 = arith.constant 2 : index
    %c0_83 = arith.constant 0 : index
    %c0_84 = arith.constant 0 : index
    %144 = vector.load %arg3[%c2, %c0_83, %c0_84] : memref<6x8x1xf32, #tpu.memory_space<vmem>>, vector<1x8x1xf32>
    %145 = vector.shape_cast %144 : vector<1x8x1xf32> to vector<8x1xf32>
    %c3 = arith.constant 3 : index
    %c0_85 = arith.constant 0 : index
    %c0_86 = arith.constant 0 : index
    %146 = vector.load %arg3[%c3, %c0_85, %c0_86] : memref<6x8x1xf32, #tpu.memory_space<vmem>>, vector<1x8x1xf32>
    %147 = vector.shape_cast %146 : vector<1x8x1xf32> to vector<8x1xf32>
    %cst_87 = arith.constant 0.000000e+00 : f32
    %148 = vector.broadcast %cst_87 : f32 to vector<8x256xf32>
    %149 = arith.maximumf %143, %148 : vector<8x256xf32>
    %150 = vector.broadcast %145 : vector<8x1xf32> to vector<8x256xf32>
    %151 = arith.mulf %149, %150 : vector<8x256xf32>
    %152 = vector.broadcast %147 : vector<8x1xf32> to vector<8x256xf32>
    %153 = arith.addf %151, %152 : vector<8x256xf32>
    %c0_88 = arith.constant 0 : index
    %c0_89 = arith.constant 0 : index
    %154 = vector.load %arg7[%c0_88, %c0_89] : memref<8x256xf32, #tpu.memory_space<vmem>>, vector<8x256xf32>
    tpu.vector_store %arg7[%c0_88, %c0_89], %153 {strides = array<i32>} : memref<8x256xf32, #tpu.memory_space<vmem>>, vector<8x256xf32>,
    %155 = vector.extract_strided_slice %153 {offsets = [0, 0], sizes = [8, 128], strides = [1, 1]} : vector<8x256xf32> to vector<8x128xf32>
    %c0_90 = arith.constant 0 : index
    %c16_91 = arith.constant 16 : index
    %c0_92 = arith.constant 0 : index
    %156 = vector.load %arg4[%c0_90, %c16_91, %c0_92] : memref<2x32x128xf32, #tpu.memory_space<vmem>>, vector<1x8x128xf32>
    %157 = vector.shape_cast %156 : vector<1x8x128xf32> to vector<8x128xf32>
    %158 = vector.shape_cast %155 : vector<8x128xf32> to vector<1x8x128xf32>
    tpu.vector_store %arg4[%c0_90, %c16_91, %c0_92], %158 {strides = array<i32>} : memref<2x32x128xf32, #tpu.memory_space<vmem>>, vector<1x8x128xf32>,
    %159 = vector.extract_strided_slice %153 {offsets = [0, 128], sizes = [8, 128], strides = [1, 1]} : vector<8x256xf32> to vector<8x128xf32>
    %c1_93 = arith.constant 1 : index
    %c16_94 = arith.constant 16 : index
    %c0_95 = arith.constant 0 : index
    %160 = vector.load %arg4[%c1_93, %c16_94, %c0_95] : memref<2x32x128xf32, #tpu.memory_space<vmem>>, vector<1x8x128xf32>
    %161 = vector.shape_cast %160 : vector<1x8x128xf32> to vector<8x128xf32>
    %162 = vector.shape_cast %159 : vector<8x128xf32> to vector<1x8x128xf32>
    tpu.vector_store %arg4[%c1_93, %c16_94, %c0_95], %162 {strides = array<i32>} : memref<2x32x128xf32, #tpu.memory_space<vmem>>, vector<1x8x128xf32>,
    %c0_96 = arith.constant 0 : index
    %c24_97 = arith.constant 24 : index
    %c0_98 = arith.constant 0 : index
    %163 = vector.load %arg1[%c0_96, %c24_97, %c0_98] : memref<2x32x64xf32, #tpu.memory_space<vmem>>, vector<1x8x64xf32>
    %164 = vector.shape_cast %163 : vector<1x8x64xf32> to vector<8x64xf32>
    %c0_99 = arith.constant 0 : index
    %c0_100 = arith.constant 0 : index
    %165 = vector.load %arg5[%c0_99, %c0_100] : memref<8x256xf32, #tpu.memory_space<vmem>>, vector<8x64xf32>
    tpu.vector_store %arg5[%c0_99, %c0_100], %164 {strides = array<i32>} : memref<8x256xf32, #tpu.memory_space<vmem>>, vector<8x64xf32>,
    %c1_101 = arith.constant 1 : index
    %c24_102 = arith.constant 24 : index
    %c0_103 = arith.constant 0 : index
    %166 = vector.load %arg1[%c1_101, %c24_102, %c0_103] : memref<2x32x64xf32, #tpu.memory_space<vmem>>, vector<1x8x64xf32>
    %167 = vector.shape_cast %166 : vector<1x8x64xf32> to vector<8x64xf32>
    %c0_104 = arith.constant 0 : index
    %c128_105 = arith.constant 128 : index
    %168 = vector.load %arg5[%c0_104, %c128_105] : memref<8x256xf32, #tpu.memory_space<vmem>>, vector<8x64xf32>
    tpu.vector_store %arg5[%c0_104, %c128_105], %167 {strides = array<i32>} : memref<8x256xf32, #tpu.memory_space<vmem>>, vector<8x64xf32>,
    %c0_106 = arith.constant 0 : index
    %c0_107 = arith.constant 0 : index
    %169 = vector.load %arg5[%c0_106, %c0_107] : memref<8x256xf32, #tpu.memory_space<vmem>>, vector<8x256xf32>
    %c0_108 = arith.constant 0 : index
    %c0_109 = arith.constant 0 : index
    %170 = vector.load %arg7[%c0_108, %c0_109] : memref<8x256xf32, #tpu.memory_space<vmem>>, vector<8x256xf32>
    %171 = arith.addf %169, %170 : vector<8x256xf32>
    %c2_i32_110 = arith.constant 2 : i32
    %172 = tpu.dynamic_rotate %171 by %c2_i32_110 dim 1 : vector<8x256xf32>, i32 -> vector<8x256xf32>
    %173 = vector.shape_cast %17 : vector<1x256xi1> to vector<1x256xi1>
    %174 = vector.broadcast %173 : vector<1x256xi1> to vector<8x256xi1>
    %175 = arith.select %174, %172, %171 : vector<8x256xi1>, vector<8x256xf32>
    %c250_i32_111 = arith.constant 250 : i32
    %176 = tpu.dynamic_rotate %171 by %c250_i32_111 dim 1 : vector<8x256xf32>, i32 -> vector<8x256xf32>
    %177 = vector.shape_cast %32 : vector<1x256xi1> to vector<1x256xi1>
    %178 = vector.broadcast %177 : vector<1x256xi1> to vector<8x256xi1>
    %179 = arith.select %178, %176, %175 : vector<8x256xi1>, vector<8x256xf32>
    %c4_i32_112 = arith.constant 4 : i32
    %180 = tpu.dynamic_rotate %171 by %c4_i32_112 dim 1 : vector<8x256xf32>, i32 -> vector<8x256xf32>
    %181 = vector.shape_cast %22 : vector<1x256xi1> to vector<1x256xi1>
    %182 = vector.broadcast %181 : vector<1x256xi1> to vector<8x256xi1>
    %183 = arith.select %182, %180, %179 : vector<8x256xi1>, vector<8x256xf32>
    %c252_i32_113 = arith.constant 252 : i32
    %184 = tpu.dynamic_rotate %171 by %c252_i32_113 dim 1 : vector<8x256xf32>, i32 -> vector<8x256xf32>
    %185 = vector.shape_cast %37 : vector<1x256xi1> to vector<1x256xi1>
    %186 = vector.broadcast %185 : vector<1x256xi1> to vector<8x256xi1>
    %187 = arith.select %186, %184, %183 : vector<8x256xi1>, vector<8x256xf32>
    %c6_i32_114 = arith.constant 6 : i32
    %188 = tpu.dynamic_rotate %171 by %c6_i32_114 dim 1 : vector<8x256xf32>, i32 -> vector<8x256xf32>
    %189 = vector.shape_cast %27 : vector<1x256xi1> to vector<1x256xi1>
    %190 = vector.broadcast %189 : vector<1x256xi1> to vector<8x256xi1>
    %191 = arith.select %190, %188, %187 : vector<8x256xi1>, vector<8x256xf32>
    %c254_i32_115 = arith.constant 254 : i32
    %192 = tpu.dynamic_rotate %171 by %c254_i32_115 dim 1 : vector<8x256xf32>, i32 -> vector<8x256xf32>
    %193 = vector.shape_cast %42 : vector<1x256xi1> to vector<1x256xi1>
    %194 = vector.broadcast %193 : vector<1x256xi1> to vector<8x256xi1>
    %195 = arith.select %194, %192, %191 : vector<8x256xi1>, vector<8x256xf32>
    %c3_i32_116 = arith.constant 3 : i32
    %196 = tpu.dynamic_rotate %195 by %c3_i32_116 dim 1 : vector<8x256xf32>, i32 -> vector<8x256xf32>
    %c0_117 = arith.constant 0 : index
    %c0_118 = arith.constant 0 : index
    %197 = vector.load %arg6[%c0_117, %c0_118] : memref<25x256xf32, #tpu.memory_space<vmem>>, vector<8x256xf32>
    tpu.vector_store %arg6[%c0_117, %c0_118], %196 {strides = array<i32>} : memref<25x256xf32, #tpu.memory_space<vmem>>, vector<8x256xf32>,
    %c8_119 = arith.constant 8 : index
    %c0_120 = arith.constant 0 : index
    %198 = vector.load %arg6[%c8_119, %c0_120] : memref<25x256xf32, #tpu.memory_space<vmem>>, vector<8x256xf32>
    tpu.vector_store %arg6[%c8_119, %c0_120], %195 {strides = array<i32>} : memref<25x256xf32, #tpu.memory_space<vmem>>, vector<8x256xf32>,
    %c253_i32_121 = arith.constant 253 : i32
    %199 = tpu.dynamic_rotate %195 by %c253_i32_121 dim 1 : vector<8x256xf32>, i32 -> vector<8x256xf32>
    %c16_122 = arith.constant 16 : index
    %c0_123 = arith.constant 0 : index
    %200 = vector.load %arg6[%c16_122, %c0_123] : memref<25x256xf32, #tpu.memory_space<vmem>>, vector<8x256xf32>
    tpu.vector_store %arg6[%c16_122, %c0_123], %199 {strides = array<i32>} : memref<25x256xf32, #tpu.memory_space<vmem>>, vector<8x256xf32>,
    %c2_124 = arith.constant 2 : index
    %c0_125 = arith.constant 0 : index
    %c0_126 = arith.constant 0 : index
    %201 = vector.load %arg2[%c2_124, %c0_125, %c0_126] : memref<3x8x25xf32, #tpu.memory_space<vmem>>, vector<1x8x25xf32>
    %202 = vector.shape_cast %201 : vector<1x8x25xf32> to vector<8x25xf32>
    %c0_127 = arith.constant 0 : index
    %c0_128 = arith.constant 0 : index
    %203 = vector.load %arg6[%c0_127, %c0_128] : memref<25x256xf32, #tpu.memory_space<vmem>>, vector<25x256xf32>
    %cst_129 = arith.constant dense<0.000000e+00> : vector<8x256xf32>
    %204 = tpu.matmul %202, %203, %cst_129 {dimension_numbers = #tpu.dot_dimension_numbers<[1], [0], [0], [1], [0, 0, 1, 1], [], []>} : vector<8x25xf32>, vector<25x256xf32>, vector<8x256xf32> -> vector<8x256xf32>
    %c4 = arith.constant 4 : index
    %c0_130 = arith.constant 0 : index
    %c0_131 = arith.constant 0 : index
    %205 = vector.load %arg3[%c4, %c0_130, %c0_131] : memref<6x8x1xf32, #tpu.memory_space<vmem>>, vector<1x8x1xf32>
    %206 = vector.shape_cast %205 : vector<1x8x1xf32> to vector<8x1xf32>
    %c5 = arith.constant 5 : index
    %c0_132 = arith.constant 0 : index
    %c0_133 = arith.constant 0 : index
    %207 = vector.load %arg3[%c5, %c0_132, %c0_133] : memref<6x8x1xf32, #tpu.memory_space<vmem>>, vector<1x8x1xf32>
    %208 = vector.shape_cast %207 : vector<1x8x1xf32> to vector<8x1xf32>
    %cst_134 = arith.constant 0.000000e+00 : f32
    %209 = vector.broadcast %cst_134 : f32 to vector<8x256xf32>
    %210 = arith.maximumf %204, %209 : vector<8x256xf32>
    %211 = vector.broadcast %206 : vector<8x1xf32> to vector<8x256xf32>
    %212 = arith.mulf %210, %211 : vector<8x256xf32>
    %213 = vector.broadcast %208 : vector<8x1xf32> to vector<8x256xf32>
    %214 = arith.addf %212, %213 : vector<8x256xf32>
    %215 = vector.extract_strided_slice %214 {offsets = [0, 0], sizes = [8, 128], strides = [1, 1]} : vector<8x256xf32> to vector<8x128xf32>
    %c0_135 = arith.constant 0 : index
    %c24_136 = arith.constant 24 : index
    %c0_137 = arith.constant 0 : index
    %216 = vector.load %arg4[%c0_135, %c24_136, %c0_137] : memref<2x32x128xf32, #tpu.memory_space<vmem>>, vector<1x8x128xf32>
    %217 = vector.shape_cast %216 : vector<1x8x128xf32> to vector<8x128xf32>
    %218 = vector.shape_cast %215 : vector<8x128xf32> to vector<1x8x128xf32>
    tpu.vector_store %arg4[%c0_135, %c24_136, %c0_137], %218 {strides = array<i32>} : memref<2x32x128xf32, #tpu.memory_space<vmem>>, vector<1x8x128xf32>,
    %219 = vector.extract_strided_slice %214 {offsets = [0, 128], sizes = [8, 128], strides = [1, 1]} : vector<8x256xf32> to vector<8x128xf32>
    %c1_138 = arith.constant 1 : index
    %c24_139 = arith.constant 24 : index
    %c0_140 = arith.constant 0 : index
    %220 = vector.load %arg4[%c1_138, %c24_139, %c0_140] : memref<2x32x128xf32, #tpu.memory_space<vmem>>, vector<1x8x128xf32>
    %221 = vector.shape_cast %220 : vector<1x8x128xf32> to vector<8x128xf32>
    %222 = vector.shape_cast %219 : vector<8x128xf32> to vector<1x8x128xf32>
    tpu.vector_store %arg4[%c1_138, %c24_139, %c0_140], %222 {strides = array<i32>} : memref<2x32x128xf32, #tpu.memory_space<vmem>>, vector<1x8x128xf32>,
    return
  }
  func.func @transform_0(%arg0: i32) -> (i32, i32, i32) {
    %c0_i32 = arith.constant 0 : i32
    %c0_i32_0 = arith.constant 0 : i32
    %c0_i32_1 = arith.constant 0 : i32
    return %arg0, %c0_i32, %c0_i32_0 : i32, i32, i32
  }
  func.func @transform_1(%arg0: i32) -> (i32, i32, i32) {
    %c0_i32 = arith.constant 0 : i32
    %c0_i32_0 = arith.constant 0 : i32
    %c0_i32_1 = arith.constant 0 : i32
    %c0_i32_2 = arith.constant 0 : i32
    return %c0_i32, %c0_i32_0, %c0_i32_1 : i32, i32, i32
  }
  func.func @transform_2(%arg0: i32) -> (i32, i32, i32) {
    %c0_i32 = arith.constant 0 : i32
    %c0_i32_0 = arith.constant 0 : i32
    %c0_i32_1 = arith.constant 0 : i32
    %c0_i32_2 = arith.constant 0 : i32
    return %c0_i32, %c0_i32_0, %c0_i32_1 : i32, i32, i32
  }
  func.func @transform_3(%arg0: i32) -> (i32, i32, i32) {
    %c0_i32 = arith.constant 0 : i32
    %c0_i32_0 = arith.constant 0 : i32
    %c0_i32_1 = arith.constant 0 : i32
    return %arg0, %c0_i32, %c0_i32_0 : i32, i32, i32
  }
}

</mosaic_0001>

<bundles_post_ra>
// kernel: tpu_custom_call.1
= control target key start
LH: loop header
LB: loop body
LE: loop exit
PB: predicated region body
PF: predicated region fallthrough
CT: control target
= control target key end

     0   :  { %8 = vsyncpa [#allocation6], 0  ;;  %s1104_s0 = inlined_call_operand.hbm [shape: f32[2,32,64], index: 0, kind: input, shape index: {}]   ;;  %s1105_s1 = inlined_call_operand.vmem [shape: f32[3,8,25], index: 1, kind: input, shape index: {}]   ;;  %s1106_s2 = inlined_call_operand.vmem [shape: f32[6,8,1], index: 2, kind: input, shape index: {}]   ;;  %s1107_s3 = inlined_call_operand.hbm [shape: f32[2,32,128], index: 3, kind: output, shape index: {}]  }
   0x1   :  { %9 = vsyncpa [#allocation7], 0  ;;  %s772_s12 = smov [#allocation5]  }
   0x2   :  { %s15_s13 = sshll.u32 %s772_s12, 4  ;;  %s16_s13 = int_to_ptr.vmem [resolvable:$true] %s15_s13 }
   0x3   :  { %s736_s14 = scalar_lea.vmem %s16_s13, 1024  ;;  %p741_p1 = scmp.lt.s32.totalorder %s16_s13, %s16_s13 }
   0x4   :  { %p737_p0 = scmp.ne.s32.totalorder %s16_s13, %s736_s14  ;;  %p742_p2 = scmp.lt.s32.totalorder %s736_s14, %s736_s14 }
   0x6   :  { %p743_p3 = por %p742_p2, %p741_p1 }
   0x8   :  { %p744_p4 = pnand %p743_p3, %p737_p0 }
   0xa   :  { %747 = shalt.err (!%p744_p4)
}
   0xb   :  { %s773_s15 = smov 128   ;;  %s774_s16 = smov 8  }
   0xc   :  { %21 = dma.hbm_to_vmem [thread:$0]  %s1104_s0, 1024, %s16_s13, [#allocation6], %s773_s15, %s773_s15, %s774_s16  }
   0xd   :  { %768 = dma.done.wait [#allocation6], 1024  }
   0xe   :  { %769 = vsyncadd [#allocation6], 4294966272  ;;  %vm1115_vm0 = vcmask 523264   ;;  %v82_v0 = vld [vmem:[#allocation5 + $0x8] sm:$0xff]  ;;  %s775_s19 = smov 122   ;;  %s776_s20 = smov 2   ;;  %v29_v4 = vlaneseq }
   0xf   :  { %v84_v1 = vld [vmem:[#allocation5 + $0x28] sm:$0xff]  ;;  %83 = vst.msk [vmem:[#allocation2] sm:$0xff] %vm1115_vm0, %v82_v0  ;;  %s777_s0 = smov 4   ;;  %s778_s21 = smov 124   ;;  %v781_v7 = vmov 1.0   ;;  %vm1116_vm3 = vcmask 1040384  }
  0x10   :  { %85 = vst.msk [vmem:[#allocation2 + $0x8] sm:$0xff] %vm1115_vm0, %v84_v1  ;;  %s779_s22 = smov 6   ;;  %s780_s23 = smov 126   ;;  %vm31_vm1 = vcmp.lt.s32.totalorder %v29_v4, 256  ;;  %v827_v8 = vand.u32 127, %v29_v4  ;;  %v782_v28 = vmov 0.0  }
  0x11   :  { %34 = vst.msk [vmem:[#allocation3 + $0x30] ss:$8 sm:$0x3] %vm31_vm1, %v781_v7  ;;  %270 = vmatprep.mubr.f32.mxu0 %v782_v28  ;;  %459 = vmatprep.mubr.f32.mxu1 %v782_v28  ;;  %v783_v35 = vmov 0   ;;  %s784_s24 = smov 125   ;;  %s785_s25 = smov 3  }
  0x12   :  { %v830_v11 = vadd.s32 128, %v827_v8  ;;  %vm1118_vm2 = vcmp.lt.s32.totalorder %v827_v8, 2  ;;  %vm1117_vm4 = vcmp.lt.s32.totalorder %v827_v8, 122  ;;  %vm1108_vm5 = vcmp.eq.s32.totalorder %v827_v8, 64  ;;  %726 = vset.pattern.permute.xlu0 %v783_v35  ;;  %727 = vset.pattern.permute.xlu1 %v783_v35  ;;  %v277_v48 = vld [vmem:[%s1106_s2] sm:$0xff]  ;;  %v698_v49 = vld [vmem:[%s1106_s2 + $0x8] sm:$0xff] }
  0x13   :  { %vm1110_vm7 = vcmp.eq.s32.totalorder %v827_v8, 125  ;;  %vm52_vm9 = vcmp.eq.s32.totalorder %v827_v8, 65  ;;  %vm118_vm11 = vcmp.lt.s32.totalorder %v827_v8, 4  ;;  %vm70_vm12 = vcmp.eq.s32.totalorder %v827_v8, 126  ;;  %v186_v58 = vld [vmem:[%s1105_s1] sm:$0xff]  ;;  %v490_v61 = vld [vmem:[#allocation5 + $0x18] sm:$0xff] }
  0x14   :  { %vm1109_vm6 = vcmp.eq.s32.totalorder %v830_v11, 192  ;;  %vm1111_vm8 = vcmp.eq.s32.totalorder %v830_v11, 253  ;;  %vm55_vm10 = vcmp.eq.s32.totalorder %v830_v11, 193  ;;  %vm73_vm13 = vcmp.eq.s32.totalorder %v830_v11, 254  ;;  %v300_v59 = vld [vmem:[#allocation5 + $0x10] sm:$0xff]  ;;  %v492_v62 = vld [vmem:[#allocation5 + $0x38] sm:$0xff] }
  0x15   :  { %vm131_vm14 = vcmp.lt.s32.totalorder %v827_v8, 124  ;;  %vm144_vm15 = vcmp.lt.s32.totalorder %v827_v8, 6  ;;  %vm61_vm1 = vcmp.eq.s32.totalorder %v830_v11, 194  ;;  %v302_v60 = vld [vmem:[#allocation5 + $0x30] sm:$0xff]  ;;  %s786_s18 = smov [#allocation8]  }
  0x16   :  { %v86_v2 = vld [vmem:[#allocation2] sm:$0xff] }
  0x17   :  { %101 = vrot.lane.b32.xlu1 %v86_v2, %s775_s19  ;;  %88 = vrot.lane.b32.xlu0 %v86_v2, %s776_s20  ;;  %v87_v3 = vld [vmem:[#allocation2 + $0x8] sm:$0xff]  ;;  %301 = vst.msk [vmem:[#allocation2] sm:$0xff] %vm1115_vm0, %v300_v59 }
  0x18   :  { %v194_v14 = vld [vmem:[#allocation3 + $0x38] sm:$0x1]  ;;  %v193_v15 = vld [vmem:[#allocation3 + $0x30] sm:$0x1]  ;;  %303 = vst.msk [vmem:[#allocation2 + $0x8] sm:$0xff] %vm1115_vm0, %v302_v60 }
  0x19   :  { %695 = vmatprep.subr.msk.mxu0 %vm1116_vm3, %v194_v14 }
  0x1a   :  { %696 = vmatpush1.msk.msra.mxu0 %vm1116_vm3, %v193_v15 }
  0x1b   :  { %103 = vrot.lane.b32.xlu1 %v87_v3, %s775_s19  ;;  %90 = vrot.lane.b32.xlu0 %v87_v3, %s776_s20 }
  0x1e   :  { %v304_v63 = vld [vmem:[#allocation2] sm:$0xff] }
  0x1f   :  { %116 = vrot.lane.b32.xlu1 %v87_v3, %s777_s0  ;;  %114 = vrot.lane.b32.xlu0 %v86_v2, %s777_s0  ;;  %491 = vst.msk [vmem:[#allocation2] sm:$0xff] %vm1115_vm0, %v490_v61  ;;  %v305_v0 = vld [vmem:[#allocation2 + $0x8] sm:$0xff] }
  0x20   :  { %493 = vst.msk [vmem:[#allocation2 + $0x8] sm:$0xff] %vm1115_vm0, %v492_v62  ;;  %vm1121_vm0 = vcmp.eq.s32.totalorder %v827_v8, 64 }
  0x23   :  { %129 = vrot.lane.b32.xlu1 %v87_v3, %s778_s21  ;;  %127 = vrot.lane.b32.xlu0 %v86_v2, %s778_s21 }
  0x27   :  { %142 = vrot.lane.b32.xlu1 %v87_v3, %s779_s22  ;;  %140 = vrot.lane.b32.xlu0 %v86_v2, %s779_s22 }
  0x2b   :  { %155 = vrot.lane.b32.xlu1 %v87_v3, %s780_s23  ;;  %153 = vrot.lane.b32.xlu0 %v86_v2, %s780_s23 }
  0x89   :  { %v102_v5 = vpop.permute.xlu1 %101  ;;  %v89_v6 = vpop.permute.xlu0 %88 }
  0x8d   :  { %v104_v9 = vpop.permute.xlu1 %103  ;;  %v91_v10 = vpop.permute.xlu0 %90 }
  0x8e   :  { %v94_v16 = vsel %vm1118_vm2, %v91_v10, %v89_v6  ;;  %v93_v17 = vsel %vm1118_vm2, %v89_v6, %v91_v10  ;;  %v106_v20 = vsel %vm1117_vm4, %v102_v5, %v104_v9  ;;  %v107_v22 = vsel %vm1117_vm4, %v104_v9, %v102_v5 }
  0x8f   :  { %v99_v21 = vsel %vm1108_vm5, %v94_v16, %v86_v2  ;;  %v100_v23 = vsel %vm1109_vm6, %v93_v17, %v87_v3  ;;  %vm1114_vm5 = vcmp.eq.s32.totalorder %v827_v8, 66  ;;  %vm157_vm6 = vcmp.lt.s32.totalorder %v827_v8, 126 }
  0x90   :  { %v112_v29 = vsel %vm1110_vm7, %v106_v20, %v99_v21  ;;  %v113_v32 = vsel %vm1111_vm8, %v107_v22, %v100_v23  ;;  %vm1113_vm7 = vcmp.eq.s32.totalorder %v830_v11, 255  ;;  %vm1112_vm8 = vcmp.eq.s32.totalorder %v827_v8, 127  ;;  %v385_v21 = vld [vmem:[#allocation3 + $0x38] sm:$0x1]  ;;  %v384_v22 = vld [vmem:[#allocation3 + $0x30] sm:$0x1] }
  0x91   :  { %v117_v12 = vpop.permute.xlu1 %116  ;;  %v115_v13 = vpop.permute.xlu0 %114  ;;  %700 = vmatprep.subr.msk.mxu1 %vm1116_vm3, %v385_v21 }
  0x92   :  { %v119_v24 = vsel %vm118_vm11, %v115_v13, %v117_v12  ;;  %v120_v25 = vsel %vm118_vm11, %v117_v12, %v115_v13  ;;  %701 = vmatpush1.msk.msra.mxu1 %vm1116_vm3, %v384_v22  ;;  %vm1122_vm3 = vcmp.eq.s32.totalorder %v830_v11, 192  ;;  %v575_v22 = vld [vmem:[#allocation3 + $0x38] sm:$0x1] }
  0x93   :  { %v125_v36 = vsel %vm52_vm9, %v120_v25, %v112_v29  ;;  %v126_v37 = vsel %vm55_vm10, %v119_v24, %v113_v32 }
  0x95   :  { %v130_v18 = vpop.permute.xlu1 %129  ;;  %v128_v19 = vpop.permute.xlu0 %127 }
  0x96   :  { %v132_v30 = vsel %vm131_vm14, %v128_v19, %v130_v18  ;;  %v133_v31 = vsel %vm131_vm14, %v130_v18, %v128_v19 }
  0x97   :  { %v138_v38 = vsel %vm70_vm12, %v132_v30, %v125_v36  ;;  %v139_v39 = vsel %vm73_vm13, %v133_v31, %v126_v37 }
  0x99   :  { %v143_v26 = vpop.permute.xlu1 %142  ;;  %v141_v27 = vpop.permute.xlu0 %140 }
  0x9a   :  { %v145_v33 = vsel %vm144_vm15, %v141_v27, %v143_v26  ;;  %v146_v34 = vsel %vm144_vm15, %v143_v26, %v141_v27 }
  0x9b   :  { %v152_v44 = vsel %vm61_vm1, %v145_v33, %v139_v39  ;;  %v151_v45 = vsel %vm1114_vm5, %v146_v34, %v138_v38  ;;  %vm1119_vm5 = vcmask 203776  }
  0x9d   :  { %v156_v40 = vpop.permute.xlu1 %155  ;;  %v154_v41 = vpop.permute.xlu0 %153 }
  0x9e   :  { %v158_v42 = vsel %vm157_vm6, %v154_v41, %v156_v40  ;;  %v159_v43 = vsel %vm157_vm6, %v156_v40, %v154_v41 }
  0x9f   :  { %v165_v46 = vsel %vm1113_vm7, %v159_v43, %v152_v44  ;;  %v164_v47 = vsel %vm1112_vm8, %v158_v42, %v151_v45  ;;  %vm181_vm8 = vcmp.lt.s32.totalorder %v827_v8, 125  ;;  %vm1120_vm7 = vcmp.lt.s32.totalorder %v827_v8, 3 }
  0xa0   :  { %179 = vrot.lane.b32.xlu1 %v165_v46, %s784_s24  ;;  %177 = vrot.lane.b32.xlu0 %v164_v47, %s784_s24 }
  0xa4   :  { %168 = vrot.lane.b32.xlu1 %v165_v46, %s785_s25  ;;  %166 = vrot.lane.b32.xlu0 %v164_v47, %s785_s25 }
  0xa8   :  { %284 = vperm.xlu0 %726, %v277_v48   ;;  %291 = vperm.xlu1 %727, %v698_v49  }
 0x112   :  { %v180_v50 = vpop.permute.xlu1 %179  ;;  %v178_v51 = vpop.permute.xlu0 %177 }
 0x113   :  { %v182_v52 = vsel %vm181_vm8, %v178_v51, %v180_v50  ;;  %v183_v53 = vsel %vm181_vm8, %v180_v50, %v178_v51 }
 0x114   :  { %232 = vmatprep.subr.mxu0 %v183_v53  ;;  %v704_v53 = vld [vmem:[%s1106_s2 + $0x18] sm:$0xff] }
 0x115   :  { %233 = vmatpush1.msra.mxu0 %v182_v52 }
 0x116   :  { %v169_v54 = vpop.permute.xlu1 %168  ;;  %v167_v55 = vpop.permute.xlu0 %166  ;;  %234 = vmatprep.subr.mxu0 %v165_v46 }
 0x117   :  { %v171_v56 = vsel %vm1120_vm7, %v167_v55, %v169_v54  ;;  %v172_v57 = vsel %vm1120_vm7, %v169_v54, %v167_v55  ;;  %235 = vmatpush1.msra.mxu0 %v164_v47  ;;  %v703_v54 = vld [vmem:[%s1106_s2 + $0x10] sm:$0xff] }
 0x118   :  { %236 = vmatprep.subr.mxu0 %v171_v56 }
 0x119   :  { %237 = vmatpush1.msra.mxu0 %v172_v57 }
 0x11a   :  { %697 = vmatmul.mubr.msk.f32.vlgmr.msra.gmra.mxu0 %vm1119_vm5, %v186_v58 }
 0x11b   :  { %649 = vmatprep.mubr.f32.mxu0 %v782_v28 }
 0x123   :  { %v285_v2 = vpop.permute.xlu0 %284  ;;  %v292_v5 = vpop.permute.xlu1 %291 }
 0x1da   :  { %v272_v1 = vpop.f32.mrf.mxu0 }
 0x1db   :  { %v280_v3 = vmax.f32 %v272_v1, 0.0 }
 0x1dc   :  { %v274_v4 = vpop.f32.mrf.mxu0 }
 0x1dd   :  { %v287_v6 = vmul.f32 %v285_v2, %v280_v3  ;;  %v281_v7 = vmax.f32 %v274_v4, 0.0 }
 0x1df   :  { %v288_v9 = vmul.f32 %v285_v2, %v281_v7  ;;  %v294_v10 = vadd.f32 %v292_v5, %v287_v6  ;;  %v494_v7 = vld [vmem:[#allocation2] sm:$0xff] }
 0x1e1   :  { %v295_v12 = vadd.f32 %v292_v5, %v288_v9  ;;  %298 = vst [vmem:[#allocation8 + $0x8] sm:$0xff] %v294_v10  ;;  %v308_v13 = vadd.f32 %v304_v63, %v294_v10  ;;  %v699_v63 = vld [vmem:[%s1105_s1 + $0x8] sm:$0xff] }
 0x1e3   :  { %299 = vst [vmem:[#allocation8 + $0x28] sm:$0xff] %v295_v12  ;;  %v309_v14 = vadd.f32 %v305_v0, %v295_v12  ;;  %310 = vrot.lane.b32.xlu1 %v308_v13, %s776_s20  ;;  %v495_v12 = vld [vmem:[#allocation2 + $0x8] sm:$0xff] }
 0x1e5   :  { %312 = vrot.lane.b32.xlu0 %v309_v14, %s776_s20 }
 0x1e7   :  { %318 = vrot.lane.b32.xlu1 %v308_v13, %s775_s19 }
 0x1e9   :  { %320 = vrot.lane.b32.xlu0 %v309_v14, %s775_s19 }
 0x1eb   :  { %326 = vrot.lane.b32.xlu1 %v308_v13, %s777_s0 }
 0x1ed   :  { %328 = vrot.lane.b32.xlu0 %v309_v14, %s777_s0 }
 0x1ef   :  { %334 = vrot.lane.b32.xlu1 %v308_v13, %s778_s21 }
 0x1f1   :  { %336 = vrot.lane.b32.xlu0 %v309_v14, %s778_s21 }
 0x1f3   :  { %342 = vrot.lane.b32.xlu1 %v308_v13, %s779_s22 }
 0x1f5   :  { %344 = vrot.lane.b32.xlu0 %v309_v14, %s779_s22 }
 0x1f7   :  { %350 = vrot.lane.b32.xlu1 %v308_v13, %s780_s23 }
 0x1f9   :  { %352 = vrot.lane.b32.xlu0 %v309_v14, %s780_s23 }
 0x255   :  { %v311_v15 = vpop.permute.xlu1 %310 }
 0x257   :  { %v313_v16 = vpop.permute.xlu0 %312 }
 0x258   :  { %v314_v25 = vsel %vm1118_vm2, %v311_v15, %v313_v16  ;;  %v315_v26 = vsel %vm1118_vm2, %v313_v16, %v311_v15  ;;  %vm1124_vm2 = vcmp.eq.s32.totalorder %v830_v11, 253 }
 0x259   :  { %v319_v17 = vpop.permute.xlu1 %318  ;;  %v316_v33 = vsel %vm1121_vm0, %v315_v26, %v308_v13  ;;  %v317_v34 = vsel %vm1122_vm3, %v314_v25, %v309_v14  ;;  %vm1125_vm0 = vcmp.eq.s32.totalorder %v827_v8, 66  ;;  %vm1127_vm3 = vcmp.eq.s32.totalorder %v827_v8, 127 }
 0x25b   :  { %v321_v18 = vpop.permute.xlu0 %320 }
 0x25c   :  { %v322_v28 = vsel %vm1117_vm4, %v319_v17, %v321_v18  ;;  %v323_v29 = vsel %vm1117_vm4, %v321_v18, %v319_v17  ;;  %vm1123_vm4 = vcmp.eq.s32.totalorder %v827_v8, 125 }
 0x25d   :  { %v327_v19 = vpop.permute.xlu1 %326  ;;  %v324_v37 = vsel %vm1123_vm4, %v322_v28, %v316_v33  ;;  %v325_v38 = vsel %vm1124_vm2, %v323_v29, %v317_v34  ;;  %vm1126_vm2 = vcmp.eq.s32.totalorder %v830_v11, 255  ;;  %vm1128_vm4 = vcmask 1040384  }
 0x25e   :  { %706 = vmatprep.subr.msk.mxu0 %vm1128_vm4, %v575_v22 }
 0x25f   :  { %v329_v20 = vpop.permute.xlu0 %328 }
 0x260   :  { %v330_v30 = vsel %vm118_vm11, %v327_v19, %v329_v20  ;;  %v331_v31 = vsel %vm118_vm11, %v329_v20, %v327_v19 }
 0x261   :  { %v335_v23 = vpop.permute.xlu1 %334  ;;  %v332_v41 = vsel %vm52_vm9, %v331_v31, %v324_v37  ;;  %v333_v42 = vsel %vm55_vm10, %v330_v30, %v325_v38 }
 0x263   :  { %v337_v24 = vpop.permute.xlu0 %336 }
 0x264   :  { %v338_v35 = vsel %vm131_vm14, %v335_v23, %v337_v24  ;;  %v339_v36 = vsel %vm131_vm14, %v337_v24, %v335_v23  ;;  %v574_v23 = vld [vmem:[#allocation3 + $0x30] sm:$0x1] }
 0x265   :  { %v343_v27 = vpop.permute.xlu1 %342  ;;  %v340_v43 = vsel %vm70_vm12, %v338_v35, %v332_v41  ;;  %v341_v44 = vsel %vm73_vm13, %v339_v36, %v333_v42 }
 0x267   :  { %v345_v32 = vpop.permute.xlu0 %344 }
 0x268   :  { %v346_v39 = vsel %vm144_vm15, %v343_v27, %v345_v32  ;;  %v347_v40 = vsel %vm144_vm15, %v345_v32, %v343_v27 }
 0x269   :  { %v351_v45 = vpop.permute.xlu1 %350  ;;  %v349_v49 = vsel %vm61_vm1, %v346_v39, %v341_v44  ;;  %v348_v50 = vsel %vm1125_vm0, %v347_v40, %v340_v43  ;;  %vm1129_vm0 = vmmov %vm1128_vm4  ;;  %vm1134_vm4 = vcmp.eq.s32.totalorder %v827_v8, 64 }
 0x26a   :  { %707 = vmatpush1.msk.msra.mxu0 %vm1129_vm0, %v574_v23  ;;  %vm1135_vm0 = vcmp.eq.s32.totalorder %v830_v11, 192 }
 0x26b   :  { %v353_v46 = vpop.permute.xlu0 %352 }
 0x26c   :  { %v354_v47 = vsel %vm157_vm6, %v351_v45, %v353_v46  ;;  %v355_v48 = vsel %vm157_vm6, %v353_v46, %v351_v45 }
 0x26d   :  { %v357_v51 = vsel %vm1126_vm2, %v355_v48, %v349_v49  ;;  %v356_v52 = vsel %vm1127_vm3, %v354_v47, %v348_v50  ;;  %vm1130_vm2 = vcmp.lt.s32.totalorder %v827_v8, 2 }
 0x26e   :  { %370 = vrot.lane.b32.xlu0 %v357_v51, %s784_s24  ;;  %368 = vrot.lane.b32.xlu1 %v356_v52, %s784_s24  ;;  %vm1131_vm3 = vmmov %vm1130_vm2 }
 0x272   :  { %360 = vrot.lane.b32.xlu0 %v357_v51, %s785_s25  ;;  %358 = vrot.lane.b32.xlu1 %v356_v52, %s785_s25 }
 0x276   :  { %481 = vperm.xlu0 %726, %v704_v53   ;;  %474 = vperm.xlu1 %727, %v703_v54   ;;  %v710_v54 = vld [vmem:[%s1106_s2 + $0x28] sm:$0xff] }
 0x2e0   :  { %v371_v55 = vpop.permute.xlu0 %370  ;;  %v369_v56 = vpop.permute.xlu1 %368 }
 0x2e1   :  { %v372_v57 = vsel %vm181_vm8, %v369_v56, %v371_v55  ;;  %v373_v58 = vsel %vm181_vm8, %v371_v55, %v369_v56 }
 0x2e2   :  { %421 = vmatprep.subr.mxu1 %v373_v58 }
 0x2e3   :  { %422 = vmatpush1.msra.mxu1 %v372_v57 }
 0x2e4   :  { %v361_v59 = vpop.permute.xlu0 %360  ;;  %v359_v60 = vpop.permute.xlu1 %358  ;;  %423 = vmatprep.subr.mxu1 %v357_v51 }
 0x2e5   :  { %v362_v61 = vsel %vm1120_vm7, %v359_v60, %v361_v59  ;;  %v363_v62 = vsel %vm1120_vm7, %v361_v59, %v359_v60  ;;  %424 = vmatpush1.msra.mxu1 %v356_v52 }
 0x2e6   :  { %425 = vmatprep.subr.mxu1 %v362_v61 }
 0x2e7   :  { %426 = vmatpush1.msra.mxu1 %v363_v62 }
 0x2e8   :  { %702 = vmatmul.mubr.msk.f32.vlgmr.msra.gmra.mxu1 %vm1119_vm5, %v699_v63  ;;  %vm1132_vm5 = vcmp.lt.s32.totalorder %v827_v8, 122  ;;  %v705_v63 = vld [vmem:[%s1105_s1 + $0x10] sm:$0xff] }
 0x2e9   :  { %vm1133_vm7 = vmmov %vm1132_vm5 }
 0x2f1   :  { %v475_v2 = vpop.permute.xlu1 %474  ;;  %v482_v6 = vpop.permute.xlu0 %481 }
 0x3a8   :  { %v461_v0 = vpop.f32.mrf.mxu1 }
 0x3a9   :  { %v470_v1 = vmax.f32 %v461_v0, 0.0  ;;  %v36_v0 = vld [vmem:[#allocation5] sm:$0xff] }
 0x3aa   :  { %v463_v3 = vpop.f32.mrf.mxu1 }
 0x3ab   :  { %v477_v4 = vmul.f32 %v475_v2, %v470_v1  ;;  %v471_v5 = vmax.f32 %v463_v3, 0.0  ;;  %v40_v1 = vld [vmem:[#allocation5 + $0x20] sm:$0xff] }
 0x3ad   :  { %v484_v9 = vadd.f32 %v482_v6, %v477_v4  ;;  %v478_v10 = vmul.f32 %v475_v2, %v471_v5 }
 0x3af   :  { %488 = vst [vmem:[#allocation8 + $0x10] sm:$0xff] %v484_v9  ;;  %v498_v13 = vadd.f32 %v494_v7, %v484_v9  ;;  %v485_v14 = vadd.f32 %v482_v6, %v478_v10 }
 0x3b1   :  { %489 = vst [vmem:[#allocation8 + $0x30] sm:$0xff] %v485_v14  ;;  %v499_v15 = vadd.f32 %v495_v12, %v485_v14  ;;  %500 = vrot.lane.b32.xlu1 %v498_v13, %s776_s20 }
 0x3b3   :  { %502 = vrot.lane.b32.xlu0 %v499_v15, %s776_s20 }
 0x3b5   :  { %508 = vrot.lane.b32.xlu1 %v498_v13, %s775_s19 }
 0x3b7   :  { %510 = vrot.lane.b32.xlu0 %v499_v15, %s775_s19  ;;  %s683_s19 = sshll.u32 %s786_s18, 4  ;;  %s684_s19 = int_to_ptr.vmem [resolvable:$true] %s683_s19 }
 0x3b8   :  { %s748_s1 = scalar_lea.vmem %s684_s19, 1024  ;;  %p753_p6 = scmp.lt.s32.totalorder %s684_s19, %s684_s19 }
 0x3b9   :  { %516 = vrot.lane.b32.xlu1 %v498_v13, %s777_s0  ;;  %p749_p5 = scmp.ne.s32.totalorder %s684_s19, %s748_s1  ;;  %p754_p7 = scmp.lt.s32.totalorder %s748_s1, %s748_s1 }
 0x3bb   :  { %518 = vrot.lane.b32.xlu0 %v499_v15, %s777_s0  ;;  %p755_p8 = por %p754_p7, %p753_p6 }
 0x3bd   :  { %524 = vrot.lane.b32.xlu1 %v498_v13, %s778_s21  ;;  %p756_p9 = pnand %p755_p8, %p749_p5 }
 0x3bf   :  { %526 = vrot.lane.b32.xlu0 %v499_v15, %s778_s21 }
 0x3c1   :  { %532 = vrot.lane.b32.xlu1 %v498_v13, %s779_s22 }
 0x3c3   :  { %534 = vrot.lane.b32.xlu0 %v499_v15, %s779_s22 }
 0x3c5   :  { %540 = vrot.lane.b32.xlu1 %v498_v13, %s780_s23 }
 0x3c7   :  { %542 = vrot.lane.b32.xlu0 %v499_v15, %s780_s23 }
 0x423   :  { %v501_v16 = vpop.permute.xlu1 %500 }
 0x425   :  { %v503_v17 = vpop.permute.xlu0 %502 }
 0x426   :  { %v504_v26 = vsel %vm1130_vm2, %v501_v16, %v503_v17  ;;  %v505_v27 = vsel %vm1131_vm3, %v503_v17, %v501_v16 }
 0x427   :  { %v509_v18 = vpop.permute.xlu1 %508  ;;  %v506_v34 = vsel %vm1134_vm4, %v505_v27, %v498_v13  ;;  %v507_v35 = vsel %vm1135_vm0, %v504_v26, %v499_v15 }
 0x429   :  { %v511_v19 = vpop.permute.xlu0 %510 }
 0x42a   :  { %v512_v29 = vsel %vm1132_vm5, %v509_v18, %v511_v19  ;;  %v513_v30 = vsel %vm1133_vm7, %v511_v19, %v509_v18  ;;  %vm1136_vm5 = vcmp.eq.s32.totalorder %v827_v8, 125  ;;  %vm1137_vm7 = vcmp.eq.s32.totalorder %v830_v11, 253 }
 0x42b   :  { %v517_v20 = vpop.permute.xlu1 %516  ;;  %v514_v38 = vsel %vm1136_vm5, %v512_v29, %v506_v34  ;;  %v515_v39 = vsel %vm1137_vm7, %v513_v30, %v507_v35 }
 0x42d   :  { %v519_v21 = vpop.permute.xlu0 %518 }
 0x42e   :  { %v520_v31 = vsel %vm118_vm11, %v517_v20, %v519_v21  ;;  %v521_v32 = vsel %vm118_vm11, %v519_v21, %v517_v20  ;;  %vm1140_vm11 = vcmp.eq.s32.totalorder %v827_v8, 127 }
 0x42f   :  { %v525_v24 = vpop.permute.xlu1 %524  ;;  %v522_v42 = vsel %vm52_vm9, %v521_v32, %v514_v38  ;;  %v523_v43 = vsel %vm55_vm10, %v520_v31, %v515_v39  ;;  %vm1138_vm9 = vcmp.eq.s32.totalorder %v827_v8, 66  ;;  %vm1139_vm10 = vcmp.eq.s32.totalorder %v830_v11, 255  ;;  %v709_v11 = vld [vmem:[%s1106_s2 + $0x20] sm:$0xff] }
 0x431   :  { %v527_v25 = vpop.permute.xlu0 %526 }
 0x432   :  { %v528_v36 = vsel %vm131_vm14, %v525_v24, %v527_v25  ;;  %v529_v37 = vsel %vm131_vm14, %v527_v25, %v525_v24 }
 0x433   :  { %v533_v28 = vpop.permute.xlu1 %532  ;;  %v530_v44 = vsel %vm70_vm12, %v528_v36, %v522_v42  ;;  %v531_v45 = vsel %vm73_vm13, %v529_v37, %v523_v43  ;;  %vm1143_vm13 = vcmask 203776  }
 0x435   :  { %v535_v33 = vpop.permute.xlu0 %534 }
 0x436   :  { %v536_v40 = vsel %vm144_vm15, %v533_v28, %v535_v33  ;;  %v537_v41 = vsel %vm144_vm15, %v535_v33, %v533_v28 }
 0x437   :  { %v541_v46 = vpop.permute.xlu1 %540  ;;  %v539_v50 = vsel %vm61_vm1, %v536_v40, %v531_v45  ;;  %v538_v51 = vsel %vm1138_vm9, %v537_v41, %v530_v44 }
 0x439   :  { %v543_v47 = vpop.permute.xlu0 %542 }
 0x43a   :  { %v544_v48 = vsel %vm157_vm6, %v541_v46, %v543_v47  ;;  %v545_v49 = vsel %vm157_vm6, %v543_v47, %v541_v46  ;;  %vm1141_vm6 = vcmp.lt.s32.totalorder %v827_v8, 3 }
 0x43b   :  { %v547_v52 = vsel %vm1139_vm10, %v545_v49, %v539_v50  ;;  %v546_v53 = vsel %vm1140_vm11, %v544_v48, %v538_v51  ;;  %vm1142_vm12 = vmmov %vm1141_vm6 }
 0x43c   :  { %560 = vrot.lane.b32.xlu0 %v547_v52, %s784_s24  ;;  %558 = vrot.lane.b32.xlu1 %v546_v53, %s784_s24 }
 0x440   :  { %550 = vrot.lane.b32.xlu0 %v547_v52, %s785_s25  ;;  %548 = vrot.lane.b32.xlu1 %v546_v53, %s785_s25 }
 0x444   :  { %671 = vperm.xlu0 %726, %v710_v54   ;;  %664 = vperm.xlu1 %727, %v709_v11  }
 0x4ae   :  { %v561_v55 = vpop.permute.xlu0 %560  ;;  %v559_v56 = vpop.permute.xlu1 %558 }
 0x4af   :  { %v562_v57 = vsel %vm181_vm8, %v559_v56, %v561_v55  ;;  %v563_v58 = vsel %vm181_vm8, %v561_v55, %v559_v56  ;;  %vm1144_vm8 = vcmask 523264  }
 0x4b0   :  { %611 = vmatprep.subr.mxu0 %v563_v58  ;;  %38 = vst.msk [vmem:[#allocation8] sm:$0xff] %vm1144_vm8, %v36_v0  ;;  %vm1145_vm14 = vmmov %vm1144_vm8 }
 0x4b1   :  { %612 = vmatpush1.msra.mxu0 %v562_v57  ;;  %42 = vst.msk [vmem:[#allocation8 + $0x20] sm:$0xff] %vm1145_vm14, %v40_v1 }
 0x4b2   :  { %v551_v59 = vpop.permute.xlu0 %550  ;;  %v549_v60 = vpop.permute.xlu1 %548  ;;  %613 = vmatprep.subr.mxu0 %v547_v52 }
 0x4b3   :  { %v552_v61 = vsel %vm1141_vm6, %v549_v60, %v551_v59  ;;  %v553_v62 = vsel %vm1142_vm12, %v551_v59, %v549_v60  ;;  %614 = vmatpush1.msra.mxu0 %v546_v53 }
 0x4b4   :  { %615 = vmatprep.subr.mxu0 %v552_v61 }
 0x4b5   :  { %616 = vmatpush1.msra.mxu0 %v553_v62 }
 0x4b6   :  { %708 = vmatmul.mubr.msk.f32.vlgmr.msra.gmra.mxu0 %vm1143_vm13, %v705_v63 }
 0x4bf   :  { %v665_v4 = vpop.permute.xlu1 %664  ;;  %v672_v7 = vpop.permute.xlu0 %671 }
 0x576   :  { %v651_v2 = vpop.f32.mrf.mxu0 }
 0x577   :  { %v660_v3 = vmax.f32 %v651_v2, 0.0 }
 0x578   :  { %v653_v8 = vpop.f32.mrf.mxu0 }
 0x579   :  { %v667_v5 = vmul.f32 %v665_v4, %v660_v3  ;;  %v661_v6 = vmax.f32 %v653_v8, 0.0 }
 0x57b   :  { %v674_v9 = vadd.f32 %v672_v7, %v667_v5  ;;  %v668_v10 = vmul.f32 %v665_v4, %v661_v6 }
 0x57d   :  { %676 = vst [vmem:[#allocation8 + $0x18] sm:$0xff] %v674_v9  ;;  %v675_v12 = vadd.f32 %v672_v7, %v668_v10 }
 0x57f   :  { %677 = vst [vmem:[#allocation8 + $0x38] sm:$0xff] %v675_v12 }
 0x580   :  { %759 = shalt.err (!%p756_p9)
}
 0x581   :  { %689 = dma.vmem_to_hbm [thread:$0]  %s684_s19, 1024, %s1107_s3, [#allocation7], %s773_s15, %s773_s15, %s774_s16  }
 0x582   :  { %770 = dma.done.wait [#allocation7], 1024  }
 0x583   :  { %771 = vsyncadd [#allocation7], 4294966272 }
 0x584   :  { %693 = vsyncpa [#allocation6], 1 }
 0x585   :  { %694 = vsyncpa [#allocation7], 1 }

</bundles_post_ra>
